<compile_context>
chip_gen: v7x
topology: tpu7x:2x2x1
jax: 0.10.0
libtpu: 0.0.40
codegen_flags: <defaults>
</compile_context>

<pallas_src>
import functools

import jax
import jax.numpy as jnp
from jax.experimental import pallas as pl
from jax.experimental.pallas import tpu as pltpu


def _round_up(x, m):
    return ((x + m - 1) // m) * m


def _content_adversary_kernel(x_ref, w_ref, b_ref, o_ref):
    # x_ref: (tile_b, C) bf16   w_ref: (C, tile_n) bf16   b_ref: (1, tile_n) f32
    # o_ref: (tile_b, tile_n)
    acc = jnp.dot(x_ref[...], w_ref[...], preferred_element_type=jnp.float32)
    acc = acc + b_ref[...]                 # bias already f32 (folded in wrapper)
    o_ref[...] = jnp.maximum(acc, 0.0).astype(o_ref.dtype)


@functools.partial(jax.jit, static_argnames=("tile_b", "tile_n", "use_bf16"))
def content_adversary_forward(style_emb, weight_t, bias, *, tile_b=None,
                              tile_n=None, use_bf16=True):
    """ReLU(stop_grad(style_emb) @ weight_t + bias) via one Pallas TPU kernel."""
    x = jax.lax.stop_gradient(style_emb)   # mirrors PyTorch .detach()
    B, C = x.shape
    C2, P = weight_t.shape
    assert C == C2, "style_size mismatch"
    out_dtype = style_emb.dtype

    # bf16 operands for full-rate MXU; f32 accumulate happens in the kernel.
    if use_bf16:
        x_k = x.astype(jnp.bfloat16)
        w_k = weight_t.astype(jnp.bfloat16)
        sublane = 16
    else:
        x_k = x.astype(jnp.float32)
        w_k = weight_t.astype(jnp.float32)
        sublane = 8
    b_k = bias.astype(jnp.float32).reshape(1, P)   # fold bias cast at trace time

    # Lane-dense output: pad vocab dim to a multiple of 128.
    P_pad = _round_up(P, 128)
    if P_pad != P:
        w_k = jnp.pad(w_k, ((0, 0), (0, P_pad - P)))
        b_k = jnp.pad(b_k, ((0, 0), (0, P_pad - P)))

    # N tile: multiple of 128, capped at 512 so weight blocks pipeline and fit
    # comfortably in v7x's smaller (64 MiB) VMEM for big vocabularies.
    if tile_n is None:
        if P_pad <= 512:
            tile_n = P_pad
        elif P_pad % 512 == 0:
            tile_n = 512
        elif P_pad % 256 == 0:
            tile_n = 256
        else:
            tile_n = 128
    assert tile_n % 128 == 0 and P_pad % tile_n == 0

    # Batch tile: sublane-aligned, capped at 256 rows so large batches produce
    # multiple "parallel" blocks (feeds both v7x TensorCores).
    if tile_b is None:
        tile_b = min(_round_up(B, sublane), 256)
    tile_b = _round_up(tile_b, sublane)
    B_pad = _round_up(B, tile_b)
    if B_pad != B:
        x_k = jnp.pad(x_k, ((0, B_pad - B), (0, 0)))

    grid = (B_pad // tile_b, P_pad // tile_n)

    out = pl.pallas_call(
        _content_adversary_kernel,
        out_shape=jax.ShapeDtypeStruct((B_pad, P_pad), out_dtype),
        grid_spec=pltpu.PrefetchScalarGridSpec(
            num_scalar_prefetch=0,
            grid=grid,
            in_specs=[
                pl.BlockSpec((tile_b, C), lambda i, j: (i, 0)),     # x rows
                pl.BlockSpec((C, tile_n), lambda i, j: (0, j)),     # weight N-tile
                pl.BlockSpec((1, tile_n), lambda i, j: (0, j)),     # bias N-tile
            ],
            out_specs=pl.BlockSpec((tile_b, tile_n), lambda i, j: (i, j)),
        ),
        compiler_params=pltpu.CompilerParams(
            dimension_semantics=("parallel", "parallel"),
        ),
    )(x_k, w_k, b_k)

    return out[:B, :P]


def _reference_forward(style_emb, weight_t, bias, *, use_bf16=True):
    x = jax.lax.stop_gradient(style_emb)
    w = weight_t
    if use_bf16:
        x = x.astype(jnp.bfloat16)
        w = w.astype(jnp.bfloat16)
    y = jnp.dot(x, w, preferred_element_type=jnp.float32) + bias.astype(jnp.float32)
    return jnp.maximum(y, 0.0).astype(style_emb.dtype)


if __name__ == "__main__":
    # Deterministic small config: style_size=32, BOW_vocab_size=48, batch=8.
    batch = 8
    style_size = 32
    bow_vocab_size = 48

    key = jax.random.PRNGKey(0)
    k_x, k_w, k_b = jax.random.split(key, 3)

    bound = 1.0 / (style_size ** 0.5)   # nn.Linear default init range
    style_emb = jax.random.normal(k_x, (batch, style_size), dtype=jnp.float32)
    weight_t = jax.random.uniform(
        k_w, (style_size, bow_vocab_size), jnp.float32, -bound, bound)
    bias = jax.random.uniform(k_b, (bow_vocab_size,), jnp.float32, -bound, bound)

    out = content_adversary_forward(style_emb, weight_t, bias)
    out = jax.block_until_ready(out)

    assert out.shape == (batch, bow_vocab_size)
    # Matched-precision reference (bf16 operands, f32 accumulate): tight check.
    ref_bf16 = _reference_forward(style_emb, weight_t, bias, use_bf16=True)
    assert jnp.allclose(out, ref_bf16, atol=1e-3, rtol=1e-3), "mismatch vs bf16 reference"
    # Full-f32 reference: loose check (bf16 operand rounding only).
    ref_f32 = _reference_forward(style_emb, weight_t, bias, use_bf16=False)
    assert jnp.allclose(out, ref_f32, atol=3e-2, rtol=3e-2), "mismatch vs f32 reference"

    print("KERNEL_OK")
</pallas_src>

<mosaic_0001>
module attributes {stable_mosaic.version = 11 : i64} {
  func.func @_content_adversary_kernel(%arg0: i32, %arg1: i32, %arg2: memref<16x32xbf16, #tpu.memory_space<vmem>>, %arg3: memref<32x128xbf16, #tpu.memory_space<vmem>>, %arg4: memref<1x128xf32, #tpu.memory_space<vmem>>, %arg5: memref<16x128xf32, #tpu.memory_space<vmem>>) attributes {dimension_semantics = [#tpu.dimension_semantics<parallel>, #tpu.dimension_semantics<parallel>], iteration_bounds = array<i64: 1, 1>, scalar_prefetch = 0 : i64, scratch_operands = 0 : i64, tpu.core_type = #tpu.core_type<tc>, window_params = [{transform_indices = @transform_0, window_bounds = array<i64: 16, 32>}, {transform_indices = @transform_1, window_bounds = array<i64: 32, 128>}, {transform_indices = @transform_2, window_bounds = array<i64: 1, 128>}, {transform_indices = @transform_3, window_bounds = array<i64: 16, 128>}]} {
    %c0 = arith.constant 0 : index
    %c0_0 = arith.constant 0 : index
    %0 = vector.load %arg2[%c0, %c0_0] : memref<16x32xbf16, #tpu.memory_space<vmem>>, vector<16x32xbf16>
    %c0_1 = arith.constant 0 : index
    %c0_2 = arith.constant 0 : index
    %1 = vector.load %arg3[%c0_1, %c0_2] : memref<32x128xbf16, #tpu.memory_space<vmem>>, vector<32x128xbf16>
    %cst = arith.constant dense<0.000000e+00> : vector<16x128xf32>
    %2 = tpu.matmul %0, %1, %cst {dimension_numbers = #tpu.dot_dimension_numbers<[1], [0], [0], [1], [0, 0, 1, 1], [], []>} : vector<16x32xbf16>, vector<32x128xbf16>, vector<16x128xf32> -> vector<16x128xf32>
    %c0_3 = arith.constant 0 : index
    %c0_4 = arith.constant 0 : index
    %3 = vector.load %arg4[%c0_3, %c0_4] : memref<1x128xf32, #tpu.memory_space<vmem>>, vector<1x128xf32>
    %4 = vector.broadcast %3 : vector<1x128xf32> to vector<16x128xf32>
    %5 = arith.addf %2, %4 : vector<16x128xf32>
    %cst_5 = arith.constant 0.000000e+00 : f32
    %6 = vector.broadcast %cst_5 : f32 to vector<16x128xf32>
    %7 = arith.maximumf %5, %6 : vector<16x128xf32>
    %c0_6 = arith.constant 0 : index
    %c0_7 = arith.constant 0 : index
    %8 = vector.load %arg5[%c0_6, %c0_7] : memref<16x128xf32, #tpu.memory_space<vmem>>, vector<16x128xf32>
    tpu.vector_store %arg5[%c0_6, %c0_7], %7 {strides = array<i32>} : memref<16x128xf32, #tpu.memory_space<vmem>>, vector<16x128xf32>,
    return
  }
  func.func @transform_0(%arg0: i32, %arg1: i32) -> (i32, i32) {
    %c0_i32 = arith.constant 0 : i32
    %c0_i32_0 = arith.constant 0 : i32
    return %arg0, %c0_i32 : i32, i32
  }
  func.func @transform_1(%arg0: i32, %arg1: i32) -> (i32, i32) {
    %c0_i32 = arith.constant 0 : i32
    %c0_i32_0 = arith.constant 0 : i32
    return %c0_i32, %arg1 : i32, i32
  }
  func.func @transform_2(%arg0: i32, %arg1: i32) -> (i32, i32) {
    %c0_i32 = arith.constant 0 : i32
    %c0_i32_0 = arith.constant 0 : i32
    return %c0_i32, %arg1 : i32, i32
  }
  func.func @transform_3(%arg0: i32, %arg1: i32) -> (i32, i32) {
    %c0_i32 = arith.constant 0 : i32
    return %arg0, %arg1 : i32, i32
  }
}

</mosaic_0001>

<bundles_post_ra>
// kernel: content_adversary_forward.1
= control target key start
LH: loop header
LB: loop body
LE: loop exit
PB: predicated region body
PF: predicated region fallthrough
CT: control target
= control target key end

     0   :  { %v119_v0 = vmov 0.0   ;;  %vm120_vm0 = vmmov 0   ;;  %vm45_vm1 = vcmask 261120   ;;  %s159_s1 = inlined_call_operand.vmem [shape: bf16[32,128], index: 1, kind: input, shape index: {}]   ;;  %s160_s0 = inlined_call_operand.vmem [shape: bf16[16,32], index: 0, kind: input, shape index: {}]   ;;  %s161_s2 = inlined_call_operand.vmem [shape: f32[1,128], index: 2, kind: input, shape index: {}]   ;;  %s162_s3 = inlined_call_operand.vmem [shape: f32[16,128], index: 3, kind: output, shape index: {}]  }
   0x1   :  { %106 = vmatprep.subr.bf16.mxu0 %v119_v0  ;;  %v116_v1 = vld [vmem:[%s159_s1] sm:$0xff]   ;;  %110 = vmatprep.mubr.msk.bf16.mxu0 %vm120_vm0, %v119_v0  ;;  %v117_v2 = vld [vmem:[%s159_s1 + $0x8] sm:$0xff]  }
   0x2   :  { %107 = vmatpush3.bf16.msra.mxu0 %v116_v1  ;;  %v118_v3 = vld [vmem:[%s160_s0] sm:$0xff]  }
   0x3   :  { %108 = vmatprep.subr.bf16.mxu0 %v119_v0  ;;  %v98_v4 = vld [vmem:[%s161_s2] ss:$0 sm:$0xff] }
   0x6   :  { %109 = vmatpush3.bf16.msra.mxu0 %v117_v2 }
   0x9   :  { %111 = vmatmul.mubr.msk.bf16.vlgmr.msra.gmra.mrb[0].mxu0 %vm45_vm1, %v118_v3 }
  0xdc   :  { %v83_v5 = vpop.f32.mrb[0].mxu0 }
  0xdd   :  { %v84_v6 = vadd.f32 %v98_v4, %v83_v5  ;;  %v112_v7 = vpop.f32.mrb[1].mxu0 }
  0xde   :  { %v86_v8 = vpop.f32.mrb[2].mxu0 }
  0xdf   :  { %v90_v9 = vmax.f32 %v84_v6, 0.0  ;;  %v87_v10 = vadd.f32 %v98_v4, %v86_v8  ;;  %v113_v11 = vpop.f32.mrb[3].mxu0 }
  0xe1   :  { %92 = vst [vmem:[%s162_s3] sm:$0xff] %v90_v9  ;;  %v91_v12 = vmax.f32 %v87_v10, 0.0 }
  0xe3   :  { %93 = vst [vmem:[%s162_s3 + $0x8] sm:$0xff] %v91_v12 }

</bundles_post_ra>
